<compile_context>
chip_gen: v6e
topology: v6e:2x2x1
jax: 0.10.0
libtpu: 0.0.40
codegen_flags: <defaults>
</compile_context>

<pallas_src>
import functools

import jax
import jax.numpy as jnp
from jax.experimental import pallas as pl
from jax.experimental.pallas import tpu as pltpu


def _round_up(n, m):
    return -(-n // m) * m


def _round_down(n, m):
    return max(m, (n // m) * m)


def _linear_softmax_kernel(x_ref, wt_ref, o_ref, *, valid_out):
    # x_ref: (TB, in_size)  — fed straight to the MXU in its native dtype.
    # wt_ref: (in_size, out_pad) pre-transposed weight, VMEM-resident across tiles.
    # o_ref: (TB, out_pad) lane-dense output tile.
    logits = jax.lax.dot_general(
        x_ref[...], wt_ref[...],
        dimension_numbers=(((1,), (0,)), ((), ())),
        preferred_element_type=jnp.float32,     # f32 accumulate on the MXU
    )
    # Mask padded output lanes so they contribute 0 to the softmax.
    if valid_out != logits.shape[-1]:
        col = jax.lax.broadcasted_iota(jnp.int32, logits.shape, 1)
        logits = jnp.where(col < valid_out, logits, -jnp.inf)
    # Numerically stable softmax in f32.  Exact division for the normalization:
    # the approximate EUP reciprocal (pl.reciprocal(..., approx=True)) leaves row
    # sums off by up to ~1e-3, which fails strict "rows sum to 1" checks.
    m = jnp.max(logits, axis=-1, keepdims=True)
    e = jnp.exp(logits - m)
    denom = jnp.sum(e, axis=-1, keepdims=True)
    o_ref[...] = (e / denom).astype(o_ref.dtype)


def net_forward(x, weight, *, tb=512, mxu_dtype=None, xla_fast_path=False):
    """Pallas TPU forward for Net: softmax(x @ weight.T, axis=-1).

    mxu_dtype: optionally cast matmul operands (e.g. jnp.bfloat16) — on v6e/v7x the
      MXU is bf16-native (~2-3x matmul throughput, half the HBM->VMEM bytes); the
      f32 accumulation and softmax math stay in f32.  Default keeps the input dtype.
    xla_fast_path: for tiny problems the pallas_call is pure per-call overhead, so
      optionally let XLA's fused dot+softmax handle them.  Off by default so this
      script always exercises the Pallas kernel.
    """
    B, in_size = x.shape
    out_size, in_size_w = weight.shape
    assert in_size == in_size_w
    out_dtype = x.dtype

    # Lane-dense output: pad out_size up to a multiple of 128.
    out_pad = _round_up(max(out_size, 1), 128)

    if xla_fast_path and B * in_size * out_pad <= (1 << 18):
        logits = jnp.dot(x, weight.T, preferred_element_type=jnp.float32)
        return jax.nn.softmax(logits, axis=-1).astype(out_dtype)

    if mxu_dtype is not None:
        x = x.astype(mxu_dtype)
        weight = weight.astype(mxu_dtype)

    # Pre-transpose weight in the wrapper (layout plumbing, not kernel compute):
    # (out_size, in_size) -> (in_size, out_pad) with zero-padded extra columns.
    wt = jnp.zeros((in_size, out_pad), dtype=weight.dtype)
    wt = wt.at[:, :out_size].set(weight.T)

    # ---- VMEM accounting: real dtype sizes, and x2 for Pallas' default
    # double-buffering of EVERY input/output (including the "resident" weight,
    # whose block index never changes but still gets two buffers).
    xb = x.dtype.itemsize
    wb = wt.dtype.itemsize
    ob = jnp.dtype(out_dtype).itemsize
    vmem_bytes = lambda t: (2 * t * in_size * xb
                            + 2 * in_size * out_pad * wb
                            + 2 * t * out_pad * ob)

    # Physical VMEM: 128 MiB on v5e/v6e, 64 MiB per TensorCore on v7x.
    try:
        vmem_cap = pltpu.get_tpu_info().vmem_capacity_bytes
    except Exception:
        vmem_cap = 64 * 1024 * 1024          # conservative fallback (v7x-sized)
    # ~24 MiB per-step budget on v7x, ~48 MiB on v5e/v6e.
    budget = min(vmem_cap * 3 // 8, 48 * 1024 * 1024)

    # Batch tile: multiple of the sublane packing (8 f32 rows / 16 bf16 rows),
    # at most tb, sized to stay within the VMEM budget.
    sub = 16 if x.dtype == jnp.bfloat16 else 8
    tb = max(sub, min(tb, _round_up(B, sub)))
    if B >= 2 * sub:
        # Keep >= 2 grid steps so dimension_semantics=("parallel",) can shard the
        # batch across both TensorCores on v7x (negligible overhead on 1-TC chips).
        tb = min(tb, _round_down(_round_up(B, sub) // 2, sub))
    tb = _round_down(tb, sub)
    while tb > sub and vmem_bytes(tb) > budget:
        tb = _round_down(tb // 2, sub)
    B_pad = _round_up(B, tb)
    x_p = x if B_pad == B else jnp.pad(x, ((0, B_pad - B), (0, 0)))

    # Scoped-VMEM defaults are 16 MiB (v5e) / 32 MiB (v6e/v7x); set the limit
    # explicitly from the actual footprint (+25% headroom) so larger tiles compile.
    vmem_limit = int(min(max(vmem_bytes(tb) * 5 // 4, 16 * 1024 * 1024),
                         vmem_cap - 8 * 1024 * 1024))

    # TODO(synk): for large out_size (vocab/classifier heads) add an output-tile grid
    # axis (tn a multiple of 128/256) with online-softmax running max/denominator in
    # VMEM scratch + pl.when finalize, instead of keeping the full weight resident.
    kernel = functools.partial(_linear_softmax_kernel, valid_out=out_size)
    out = pl.pallas_call(
        kernel,
        out_shape=jax.ShapeDtypeStruct((B_pad, out_pad), out_dtype),
        grid_spec=pltpu.PrefetchScalarGridSpec(
            num_scalar_prefetch=0,
            grid=(B_pad // tb,),
            in_specs=[
                pl.BlockSpec((tb, in_size), lambda i: (i, 0)),
                pl.BlockSpec((in_size, out_pad), lambda i: (0, 0)),  # VMEM-resident
            ],
            out_specs=pl.BlockSpec((tb, out_pad), lambda i: (i, 0)),
        ),
        compiler_params=pltpu.CompilerParams(
            # Independent batch tiles: shard across both TensorCores on v7x.
            dimension_semantics=("parallel",),
            vmem_limit_bytes=vmem_limit,
        ),
    )(x_p, wt)
    return out[:B, :out_size]


if __name__ == "__main__":
    key = jax.random.PRNGKey(0)
    k_x, k_w = jax.random.split(key)

    B, in_size, out_size = 8, 32, 4  # small shapes consistent with Net(in_size, out_size)

    x = jax.random.normal(k_x, (B, in_size), dtype=jnp.float32)
    # Deterministic init mimicking nn.Linear default (uniform(-1/sqrt(in), 1/sqrt(in)))
    bound = 1.0 / jnp.sqrt(jnp.float32(in_size))
    weight = jax.random.uniform(
        k_w, (out_size, in_size), dtype=jnp.float32, minval=-bound, maxval=bound
    )

    out = net_forward(x, weight)
    out = jax.block_until_ready(out)

    # sanity: reference in plain JAX
    ref = jax.nn.softmax(x @ weight.T, axis=-1)
    assert out.shape == (B, out_size), "bad output shape"
    assert jnp.allclose(out, ref, atol=2e-3, rtol=2e-3), "mismatch vs reference"
    assert jnp.allclose(jnp.sum(out, axis=-1), 1.0, atol=1e-4), "rows must sum to 1"

    print("KERNEL_OK")
</pallas_src>

<mosaic_0001>
module attributes {stable_mosaic.version = 11 : i64} {
  func.func @_linear_softmax_kernel(%arg0: i32, %arg1: memref<8x32xf32, #tpu.memory_space<vmem>>, %arg2: memref<32x128xf32, #tpu.memory_space<vmem>>, %arg3: memref<8x128xf32, #tpu.memory_space<vmem>>) attributes {dimension_semantics = [#tpu.dimension_semantics<parallel>], iteration_bounds = array<i64: 1>, scalar_prefetch = 0 : i64, scratch_operands = 0 : i64, tpu.core_type = #tpu.core_type<tc>, window_params = [{transform_indices = @transform_0, window_bounds = array<i64: 8, 32>}, {pipeline_mode = #tpu.pipeline_mode<synchronous>, transform_indices = @transform_1, window_bounds = array<i64: 32, 128>}, {transform_indices = @transform_2, window_bounds = array<i64: 8, 128>}]} {
    %c0 = arith.constant 0 : index
    %c0_0 = arith.constant 0 : index
    %0 = vector.load %arg1[%c0, %c0_0] : memref<8x32xf32, #tpu.memory_space<vmem>>, vector<8x32xf32>
    %c0_1 = arith.constant 0 : index
    %c0_2 = arith.constant 0 : index
    %1 = vector.load %arg2[%c0_1, %c0_2] : memref<32x128xf32, #tpu.memory_space<vmem>>, vector<32x128xf32>
    %cst = arith.constant dense<0.000000e+00> : vector<8x128xf32>
    %2 = tpu.matmul %0, %1, %cst {dimension_numbers = #tpu.dot_dimension_numbers<[1], [0], [0], [1], [0, 0, 1, 1], [], []>} : vector<8x32xf32>, vector<32x128xf32>, vector<8x128xf32> -> vector<8x128xf32>
    %3 = tpu.iota {dimensions = array<i32: 1>} : vector<8x128xi32>
    %c4_i32 = arith.constant 4 : i32
    %4 = vector.broadcast %c4_i32 : i32 to vector<8x128xi32>
    %5 = arith.cmpi slt, %3, %4 : vector<8x128xi32>
    %cst_3 = arith.constant 0xFF800000 : f32
    %6 = vector.broadcast %cst_3 : f32 to vector<8x128xf32>
    %7 = arith.select %5, %2, %6 : vector<8x128xi1>, vector<8x128xf32>
    %cst_4 = arith.constant dense<0xFF800000> : vector<8xf32>
    %8 = vector.multi_reduction <maximumf>, %7, %cst_4 [1] : vector<8x128xf32> to vector<8xf32>
    %9 = vector.shape_cast %8 : vector<8xf32> to vector<8x1xf32>
    %10 = vector.broadcast %9 : vector<8x1xf32> to vector<8x128xf32>
    %11 = arith.subf %7, %10 : vector<8x128xf32>
    %12 = math.exp %11 : vector<8x128xf32>
    %cst_5 = arith.constant dense<0.000000e+00> : vector<8xf32>
    %13 = vector.multi_reduction <add>, %12, %cst_5 [1] : vector<8x128xf32> to vector<8xf32>
    %14 = vector.shape_cast %13 : vector<8xf32> to vector<8x1xf32>
    %15 = vector.broadcast %14 : vector<8x1xf32> to vector<8x128xf32>
    %16 = arith.divf %12, %15 : vector<8x128xf32>
    %c0_6 = arith.constant 0 : index
    %c0_7 = arith.constant 0 : index
    %17 = vector.load %arg3[%c0_6, %c0_7] : memref<8x128xf32, #tpu.memory_space<vmem>>, vector<8x128xf32>
    tpu.vector_store %arg3[%c0_6, %c0_7], %16 {strides = array<i32>} : memref<8x128xf32, #tpu.memory_space<vmem>>, vector<8x128xf32>,
    return
  }
  func.func @transform_0(%arg0: i32) -> (i32, i32) {
    %c0_i32 = arith.constant 0 : i32
    %c0_i32_0 = arith.constant 0 : i32
    return %arg0, %c0_i32 : i32, i32
  }
  func.func @transform_1(%arg0: i32) -> (i32, i32) {
    %c0_i32 = arith.constant 0 : i32
    %c0_i32_0 = arith.constant 0 : i32
    %c0_i32_1 = arith.constant 0 : i32
    return %c0_i32, %c0_i32_0 : i32, i32
  }
  func.func @transform_2(%arg0: i32) -> (i32, i32) {
    %c0_i32 = arith.constant 0 : i32
    %c0_i32_0 = arith.constant 0 : i32
    return %arg0, %c0_i32 : i32, i32
  }
}

</mosaic_0001>

<bundles_post_ra>
// kernel: tpu_custom_call.1
= control target key start
LH: loop header
LB: loop body
LE: loop exit
PB: predicated region body
PF: predicated region fallthrough
CT: control target
= control target key end

     0   :  { %7 = vsyncpa [#allocation3], 0  ;;  %s272_s0 = inlined_call_operand.hbm [shape: f32[8,32], index: 0, kind: input, shape index: {}]   ;;  %s273_s1 = inlined_call_operand.hbm [shape: f32[32,128], index: 1, kind: input, shape index: {}]   ;;  %s274_s2 = inlined_call_operand.hbm [shape: f32[8,128], index: 2, kind: output, shape index: {}]  }
   0x1   :  { %8 = vsyncpa [#allocation6], 0 }
   0x2   :  { %9 = vsyncpa [#allocation4], 0  ;;  %s241_s9 = smov [#allocation2]   ;;  %s242_s11 = smov [#allocation5]  }
   0x3   :  { %s16_s10 = sshll.u32 %s241_s9, 4  ;;  %s25_s12 = sshll.u32 %s242_s11, 4  ;;  %s17_s10 = int_to_ptr.vmem [resolvable:$true] %s16_s10  ;;  %s26_s12 = int_to_ptr.vmem [resolvable:$true] %s25_s12 }
   0x4   :  { %s183_s13 = scalar_lea.vmem %s17_s10, 128  ;;  %p188_p1 = scmp.lt.s32.totalorder %s17_s10, %s17_s10 }
   0x5   :  { %p184_p0 = scmp.ne.s32.totalorder %s17_s10, %s183_s13  ;;  %p189_p2 = scmp.lt.s32.totalorder %s183_s13, %s183_s13 }
   0x7   :  { %p190_p3 = por %p189_p2, %p188_p1 }
   0x9   :  { %p191_p4 = pnand %p190_p3, %p184_p0 }
   0xb   :  { %194 = shalt.err (!%p191_p4)
}
   0xc   :  { %19 = dma.hbm_to_vmem [thread:$0]  %s272_s0, 128, %s17_s10, [#allocation3]  }
   0xd   :  { %s203_s16 = scalar_lea.vmem %s26_s12, 512  ;;  %p208_p6 = scmp.lt.s32.totalorder %s26_s12, %s26_s12 }
   0xe   :  { %p204_p5 = scmp.ne.s32.totalorder %s26_s12, %s203_s16  ;;  %p209_p7 = scmp.lt.s32.totalorder %s203_s16, %s203_s16 }
  0x10   :  { %p210_p8 = por %p209_p7, %p208_p6 }
  0x12   :  { %p211_p9 = pnand %p210_p8, %p204_p5 }
  0x14   :  { %214 = shalt.err (!%p211_p9)
}
  0x15   :  { %s243_s17 = smov 128   ;;  %s244_s18 = smov 8  }
  0x16   :  { %31 = dma.hbm_to_vmem [thread:$0]  %s273_s1, 512, %s26_s12, [#allocation6], %s243_s17, %s243_s17, %s244_s18  }
  0x17   :  { %235 = dma.done.wait [#allocation3], 128  }
  0x18   :  { %236 = vsyncadd [#allocation3], 4294967168 }
  0x19   :  { %237 = dma.done.wait [#allocation6], 512  }
  0x1a   :  { %238 = vsyncadd [#allocation6], 4294966784  ;;  %v245_v0 = vmov 0.0   ;;  %vm246_vm0 = vmmov 0   ;;  %v42_v1 = vld [vmem:[#allocation5 + $0x18] sm:$0xff]  ;;  %v41_v2 = vld [vmem:[#allocation5 + $0x10] sm:$0xff]  ;;  %v117_v6 = vlaneseq }
  0x1b   :  { %153 = vmatprep.subr.mxu0 %v245_v0  ;;  %161 = vmatprep.mubr.msk.f32.mxu0 %vm246_vm0, %v245_v0  ;;  %v40_v3 = vld [vmem:[#allocation5 + $0x8] sm:$0xff]  ;;  %v39_v4 = vld [vmem:[#allocation5] sm:$0xff]  ;;  %v38_v5 = vld [vmem:[#allocation2] sm:$0xff]  ;;  %vm43_vm1 = vcmask 261120   ;;  %s247_s0 = smov [#allocation7]  }
  0x1c   :  { %154 = vmatpush3.msra.mxu0 %v42_v1  ;;  %v118_v7 = vand.u32 127, %v117_v6  ;;  %s137_s1 = sshll.u32 %s247_s0, 4  ;;  %s138_s1 = int_to_ptr.vmem [resolvable:$true] %s137_s1 }
  0x1d   :  { %155 = vmatprep.subr.mxu0 %v245_v0  ;;  %s215_s21 = scalar_lea.vmem %s138_s1, 128  ;;  %p220_p11 = scmp.lt.s32.totalorder %s138_s1, %s138_s1 }
  0x1e   :  { %156 = vmatpush3.msra.mxu0 %v41_v2  ;;  %vm119_vm2 = vcmp.lt.s32.totalorder %v118_v7, 4  ;;  %p216_p10 = scmp.ne.s32.totalorder %s138_s1, %s215_s21  ;;  %p221_p12 = scmp.lt.s32.totalorder %s215_s21, %s215_s21 }
  0x1f   :  { %157 = vmatprep.subr.mxu0 %v245_v0 }
  0x20   :  { %158 = vmatpush3.msra.mxu0 %v40_v3  ;;  %p222_p13 = por %p221_p12, %p220_p11 }
  0x21   :  { %159 = vmatprep.subr.mxu0 %v245_v0 }
  0x22   :  { %160 = vmatpush3.msra.mxu0 %v39_v4  ;;  %p223_p0 = pnand %p222_p13, %p216_p10 }
  0x23   :  { %162 = vmatmul.mubr.msk.f32.vlgmr.msra.gmra.mxu0 %vm43_vm1, %v38_v5 }
  0xe3   :  { %v113_v8 = vpop.f32.mrf.mxu0 }
  0xe4   :  { %v120_v9 = vsel %vm119_vm2, %v113_v8, -inf }
  0xe5   :  { %121 = vmax.xlane.f32.xlu0 %v120_v9  ;;  %v163_v10 = vpop.f32.mrf.mxu0 }
 0x16e   :  { %v122_v11 = vpop.xlane.xlu0 %121 }
 0x16f   :  { %v123_v12 = vsub.f32 %v120_v9, %v122_v11 }
 0x171   :  { %v124_v13 = vmul.f32 1.442695, %v123_v12 }
 0x173   :  { %171 = vpow2.f32 %v124_v13 }
 0x180   :  { %v172_v14 = vpop.eup %171 }
 0x181   :  { %126 = vadd.xlane.f32.xlu0 %v172_v14 }
 0x20a   :  { %v127_v15 = vpop.xlane.xlu0 %126 }
 0x20b   :  { %173 = vrcp.f32 %v127_v15 }
 0x218   :  { %v174_v16 = vpop.eup %173 }
 0x219   :  { %v129_v17 = vmul.f32 %v174_v16, %v172_v14 }
 0x21b   :  { %130 = vst [vmem:[#allocation7] sm:$0xff] %v129_v17 }
 0x21c   :  { %226 = shalt.err (!%p223_p0)
}
 0x21d   :  { %140 = dma.vmem_to_hbm [thread:$0]  %s138_s1, 128, %s274_s2, [#allocation4]  }
 0x21e   :  { %239 = dma.done.wait [#allocation4], 128  }
 0x21f   :  { %240 = vsyncadd [#allocation4], 4294967168 }
 0x220   :  { %144 = vsyncpa [#allocation3], 1 }
 0x221   :  { %145 = vsyncpa [#allocation6], 1 }
 0x222   :  { %146 = vsyncpa [#allocation4], 1 }

</bundles_post_ra>
